<compile_context>
chip_gen: v7x
topology: tpu7x:2x2x1
jax: 0.10.0
libtpu: 0.0.40
codegen_flags: <defaults>
</compile_context>

<pallas_src>
import functools

import jax
import jax.numpy as jnp
import numpy as np
from jax import lax
from jax.experimental import pallas as pl
from jax.experimental.pallas import tpu as pltpu


def _hw_budgets():
    """Per-generation tile budgets (bytes) and scoped-VMEM request."""
    vmem_phys = 0
    try:
        info = pltpu.get_tpu_info()
        for name in ("vmem_capacity_bytes", "vmem_bytes", "vmem_size_bytes"):
            v = getattr(info, name, None)
            if v:
                vmem_phys = int(v)
                break
    except Exception:
        vmem_phys = 0
    if vmem_phys <= 0:
        vmem_phys = 64 << 20                      # assume smallest (v7x-like)

    if vmem_phys >= (96 << 20):                   # v5e / v6e: 128 MiB physical
        return {
            "whiten_tile": 8 << 20,
            "moments_tile": 16 << 20,
            "vmem_limit": 80 << 20,
        }
    else:                                         # v7x: 64 MiB physical
        return {
            "whiten_tile": 4 << 20,
            "moments_tile": 12 << 20,
            "vmem_limit": 48 << 20,
        }


def _pick_m_tile(m_dim, d_eff, itemsize, tile_bytes):
    """Choose the lane-tile size. Returns (tm, n_tiles, needs_tail_mask)."""
    bytes_per_lane = max(8, d_eff) * itemsize     # avoid degenerate ultra-wide tiles
    max_lanes = (tile_bytes // bytes_per_lane) // 128 * 128
    max_lanes = max(128, max_lanes)
    if m_dim <= max_lanes:
        # whole m extent in one tile (full-extent block is always legal)
        return m_dim, 1, False
    if m_dim % 128 == 0:
        # prefer an evenly dividing tile if it is not much smaller than budget
        t = max_lanes
        while t >= 128:
            if m_dim % t == 0:
                break
            t -= 128
        if t >= max_lanes // 2:
            return t, m_dim // t, False
    tm = max_lanes
    n_mt = -(-m_dim // tm)                        # cdiv
    return tm, n_mt, (n_mt * tm != m_dim)


def _moments_kernel(x_ref, xxt_ref, s_ref, *, m_valid, needs_mask):
    """Pass 1: accumulate raw X·X^T and per-channel sums into resident outputs."""
    n_idx = pl.program_id(2)
    mt_idx = pl.program_id(3)

    @pl.when(jnp.logical_and(n_idx == 0, mt_idx == 0))
    def _init():
        xxt_ref[...] = jnp.zeros_like(xxt_ref)
        s_ref[...] = jnp.zeros_like(s_ref)

    x = x_ref[0]                                  # (d_eff, tm), activation dtype
    if needs_mask:
        tm = x.shape[1]
        col = mt_idx * tm + lax.broadcasted_iota(jnp.int32, x.shape, 1)
        x = jnp.where(col < m_valid, x, jnp.zeros_like(x))

    # Raw second moment: contract the lane axis of both operands (A @ A^T
    # without a materialized transpose), f32 accumulation on the MXU.
    xxt_ref[0, 0] += lax.dot_general(
        x, x, dimension_numbers=(((1,), (1,)), ((), ())),
        preferred_element_type=jnp.float32)

    # Per-channel sums via a lane-dense (1, tm) ones vector contracted on the
    # lane axis (f32 MXU accumulation; no (tm,1) constant, no row-sum dup).
    ones_row = jnp.ones((1, x.shape[1]), dtype=x.dtype)
    s_ref[0, 0] += lax.dot_general(
        x, ones_row, dimension_numbers=(((1,), (1,)), ((), ())),
        preferred_element_type=jnp.float32)


def _whiten_kernel(wm_ref, shift_ref, x_ref, o_ref):
    """Pass 2: out = wm_scaled @ x + shift, streamed tile by tile."""
    x = x_ref[0]                                  # (d_eff, tm), activation dtype
    y = jnp.dot(wm_ref[0], x, preferred_element_type=jnp.float32) + shift_ref[0]
    o_ref[0] = y.astype(o_ref.dtype)


def _newton_schulz_solve(xxt, ssum, m_total, T, eps):
    """Tiny d x d solve in plain f32 JAX (O(T*d^3), negligible)."""
    # NOTE: Sigma is formed as E[XX^T] - mu mu^T; fine in f32 accumulation.
    mean = ssum / float(m_total)                                  # (g, d, 1)
    d = xxt.shape[-1]
    eye = jnp.eye(d, dtype=jnp.float32)
    sigma = (xxt / float(m_total)
             - mean * jnp.swapaxes(mean, -1, -2)
             + eps * eye)
    trace = jnp.sum(sigma * eye, axis=(-2, -1), keepdims=True)    # (g, 1, 1)
    rtr = 1.0 / trace
    sigma_n = sigma * rtr
    p = jnp.broadcast_to(eye, sigma.shape)
    for _ in range(T):
        p3 = jnp.einsum('gij,gjk,gkl->gil', p, p, p)
        p = 1.5 * p - 0.5 * jnp.einsum('gij,gjk->gik', p3, sigma_n)
    wm = p * jnp.sqrt(rtr)
    return wm, mean


def zca2_forward(X, running_mean, running_wm, *, num_channels, T=5, eps=1e-5,
                 momentum=0.1, weight=None, bias=None, training=True):
    """Forward pass of ZCA2 (IterNorm). Returns (out, new_running_mean, new_running_wm)."""
    N, C = X.shape[0], X.shape[1]
    spatial = tuple(X.shape[2:])
    d = num_channels
    g = C // d
    msp = int(np.prod(spatial)) if spatial else 1
    m_total = N * msp
    itemsize = jnp.dtype(X.dtype).itemsize
    budgets = _hw_budgets()

    # ---- layout: index the (N, C, H*W) view directly (free reshape).  The
    # per-group channel block must satisfy the (8,128) BlockSpec rule; if it
    # does not, pad the channel axis per group (single pad pass) instead of
    # transposing the whole activation.
    if d == C or d % 8 == 0:
        d_eff = d
        xv = X.reshape(N, C, msp)
    else:
        sub = max(8, 32 // itemsize)              # 8 for f32, 16 for bf16, ...
        d_eff = ((d + sub - 1) // sub) * sub
        x4 = X.reshape(N, g, d, msp)
        xv = jnp.pad(x4, ((0, 0), (0, 0), (0, d_eff - d), (0, 0)))
        xv = xv.reshape(N, g * d_eff, msp)

    # ------------------------------------------------------------------ pass 1
    if training:
        tm1, n_mt1, mask1 = _pick_m_tile(msp, d_eff, itemsize,
                                         budgets["moments_tile"])
        # Split the reduction across a leading parallel axis so both v7x
        # TensorCores get work when g == 1 (costs nothing on single-TC chips).
        # TODO(synk): also split along m-tiles when N is odd but n_mt1 is even.
        n_split = 2 if (N % 2 == 0 and N >= 2) else 1
        n_per_split = N // n_split

        moments = functools.partial(_moments_kernel, m_valid=msp,
                                    needs_mask=mask1)
        x_spec1 = pl.BlockSpec(
            (1, d_eff, tm1),
            lambda gi, si, n, mt: (si * n_per_split + n, gi, mt))
        xxt_spec = pl.BlockSpec((1, 1, d_eff, d_eff),
                                lambda gi, si, n, mt: (gi, si, 0, 0))
        s_spec = pl.BlockSpec((1, 1, d_eff, 1),
                              lambda gi, si, n, mt: (gi, si, 0, 0))

        xxt_part, s_part = pl.pallas_call(
            moments,
            out_shape=(
                jax.ShapeDtypeStruct((g, n_split, d_eff, d_eff), jnp.float32),
                jax.ShapeDtypeStruct((g, n_split, d_eff, 1), jnp.float32),
            ),
            grid_spec=pltpu.PrefetchScalarGridSpec(
                num_scalar_prefetch=0,
                grid=(g, n_split, n_per_split, n_mt1),
                in_specs=[x_spec1],
                out_specs=[xxt_spec, s_spec],
            ),
            compiler_params=pltpu.CompilerParams(
                dimension_semantics=("parallel", "parallel",
                                     "arbitrary", "arbitrary"),
                vmem_limit_bytes=budgets["vmem_limit"]),
        )(xv)

        xxt = jnp.sum(xxt_part, axis=1)[:, :d, :d]        # (g, d, d) f32
        ssum = jnp.sum(s_part, axis=1)[:, :d, :]          # (g, d, 1) f32
        wm_g, mean_g = _newton_schulz_solve(xxt, ssum, m_total, T, eps)

        new_running_mean = momentum * mean_g + (1.0 - momentum) * running_mean
        new_running_wm = momentum * wm_g + (1.0 - momentum) * running_wm
    else:
        wm_g = running_wm.astype(jnp.float32)
        mean_g = running_mean.astype(jnp.float32)
        new_running_mean, new_running_wm = running_mean, running_wm

    # ---- fuse the affine into the whitening matmul:
    #   out = diag(w) wm (x - mu) + b = (w * wm) @ x + (b - (w * wm) @ mu)
    if weight is not None:
        w_g = weight.reshape(g, d, 1).astype(jnp.float32)
        b_g = bias.reshape(g, d, 1).astype(jnp.float32)
    else:
        w_g = jnp.ones((g, d, 1), jnp.float32)
        b_g = jnp.zeros((g, d, 1), jnp.float32)
    wm_s = wm_g.astype(jnp.float32) * w_g                          # (g, d, d)
    shift = b_g - jnp.matmul(wm_s, mean_g.astype(jnp.float32))     # (g, d, 1)

    if d_eff != d:
        wm_s = jnp.pad(wm_s, ((0, 0), (0, d_eff - d), (0, d_eff - d)))
        shift = jnp.pad(shift, ((0, 0), (0, d_eff - d), (0, 0)))

    wm_x = wm_s.astype(X.dtype)          # pre-cast: no per-step cast in kernel

    # ------------------------------------------------------------------ pass 2
    tm2, n_mt2, _ = _pick_m_tile(msp, d_eff, itemsize, budgets["whiten_tile"])
    x_spec2 = pl.BlockSpec((1, d_eff, tm2), lambda gi, n, mt: (n, gi, mt))
    grp_mat = pl.BlockSpec((1, d_eff, d_eff), lambda gi, n, mt: (gi, 0, 0))
    grp_vec = pl.BlockSpec((1, d_eff, 1), lambda gi, n, mt: (gi, 0, 0))

    out_v = pl.pallas_call(
        _whiten_kernel,
        out_shape=jax.ShapeDtypeStruct(xv.shape, X.dtype),
        grid_spec=pltpu.PrefetchScalarGridSpec(
            num_scalar_prefetch=0,
            grid=(g, N, n_mt2),
            in_specs=[grp_mat, grp_vec, x_spec2],
            out_specs=x_spec2,
        ),
        compiler_params=pltpu.CompilerParams(
            dimension_semantics=("parallel", "parallel", "parallel"),
            vmem_limit_bytes=budgets["vmem_limit"]),
    )(wm_x, shift, xv)

    if d_eff == d:
        out = out_v.reshape((N, C) + spatial)
    else:
        out = out_v.reshape(N, g, d_eff, msp)[:, :, :d, :]
        out = out.reshape((N, C) + spatial)
    return out, new_running_mean, new_running_wm


def _reference_forward(X, running_mean, running_wm, *, num_channels, T, eps,
                       momentum, weight, bias):
    """Pure-JAX reference mirroring the PyTorch training forward (centered form)."""
    N, C = X.shape[0], X.shape[1]
    spatial = tuple(X.shape[2:])
    d = num_channels
    g = C // d
    m = N
    for s in spatial:
        m *= s
    perm = (1, 0) + tuple(range(2, X.ndim))
    x = jnp.transpose(X, perm).reshape(g, d, m).astype(jnp.float32)
    mean = jnp.mean(x, axis=-1, keepdims=True)
    xc = x - mean
    eye = jnp.broadcast_to(jnp.eye(d, dtype=jnp.float32), (g, d, d))
    sigma = eps * eye + (1.0 / m) * jnp.einsum('gdm,gem->gde', xc, xc)
    rTr = 1.0 / jnp.sum(sigma * eye, axis=(1, 2), keepdims=True)
    sigma_n = sigma * rTr
    P = eye
    for _ in range(T):
        P3 = jnp.einsum('gij,gjk,gkl->gil', P, P, P)
        P = 1.5 * P - 0.5 * jnp.einsum('gij,gjk->gik', P3, sigma_n)
    wm = P * jnp.sqrt(rTr)
    xn = jnp.einsum('gij,gjm->gim', wm, xc)
    Xn = jnp.transpose(xn.reshape((C, N) + spatial), perm)
    return Xn * weight + bias


if __name__ == "__main__":
    # Module config: num_features=4, num_groups=1 -> num_channels=4, g=1, T=5
    N, C, H, W = 2, 4, 16, 16
    num_features = C
    num_channels = 4
    num_groups = num_features // num_channels
    T, eps, momentum = 5, 1e-5, 0.1

    key = jax.random.PRNGKey(0)
    X = jax.random.normal(key, (N, C, H, W), dtype=jnp.float32)

    # deterministic parameter / buffer init (as in reset_parameters / __init__)
    weight = jnp.ones((1, num_features, 1, 1), dtype=jnp.float32)
    bias = jnp.zeros((1, num_features, 1, 1), dtype=jnp.float32)
    running_mean = jnp.zeros((num_groups, num_channels, 1), dtype=jnp.float32)
    running_wm = jnp.broadcast_to(
        jnp.eye(num_channels, dtype=jnp.float32),
        (num_groups, num_channels, num_channels))

    out, new_rm, new_rwm = zca2_forward(
        X, running_mean, running_wm,
        num_channels=num_channels, T=T, eps=eps, momentum=momentum,
        weight=weight, bias=bias, training=True)
    jax.block_until_ready((out, new_rm, new_rwm))

    ref = _reference_forward(
        X, running_mean, running_wm,
        num_channels=num_channels, T=T, eps=eps, momentum=momentum,
        weight=weight, bias=bias)
    np.testing.assert_allclose(np.asarray(out), np.asarray(ref),
                               rtol=2e-3, atol=2e-3)

    print("KERNEL_OK")
</pallas_src>

<mosaic_0001>
module attributes {stable_mosaic.version = 11 : i64} {
  func.func @_moments_kernel(%arg0: i32, %arg1: i32, %arg2: i32, %arg3: i32, %arg4: memref<1x4x256xf32, #tpu.memory_space<vmem>>, %arg5: memref<1x1x4x4xf32, #tpu.memory_space<vmem>>, %arg6: memref<1x1x4x1xf32, #tpu.memory_space<vmem>>) attributes {dimension_semantics = [#tpu.dimension_semantics<parallel>, #tpu.dimension_semantics<parallel>, #tpu.dimension_semantics<arbitrary>, #tpu.dimension_semantics<arbitrary>], iteration_bounds = array<i64: 1, 2, 1, 1>, scalar_prefetch = 0 : i64, scratch_operands = 0 : i64, tpu.core_type = #tpu.core_type<tc>, window_params = [{transform_indices = @transform_0, window_bounds = array<i64: 1, 4, 256>}, {transform_indices = @transform_1, window_bounds = array<i64: 1, 1, 4, 4>}, {transform_indices = @transform_2, window_bounds = array<i64: 1, 1, 4, 1>}]} {
    %c0_i32 = arith.constant 0 : i32
    %0 = arith.cmpi eq, %arg2, %c0_i32 : i32
    %c0_i32_0 = arith.constant 0 : i32
    %1 = arith.cmpi eq, %arg3, %c0_i32_0 : i32
    %2 = arith.andi %0, %1 : i1
    %3 = arith.extui %2 : i1 to i32
    %c0_i32_1 = arith.constant 0 : i32
    %4 = arith.cmpi ne, %3, %c0_i32_1 : i32
    scf.if %4 {
      %cst_22 = arith.constant 0.000000e+00 : f32
      %22 = vector.broadcast %cst_22 : f32 to vector<1x1x4x4xf32>
      %c0_23 = arith.constant 0 : index
      %c0_24 = arith.constant 0 : index
      %c0_25 = arith.constant 0 : index
      %c0_26 = arith.constant 0 : index
      %23 = vector.load %arg5[%c0_23, %c0_24, %c0_25, %c0_26] : memref<1x1x4x4xf32, #tpu.memory_space<vmem>>, vector<1x1x4x4xf32>
      tpu.vector_store %arg5[%c0_23, %c0_24, %c0_25, %c0_26], %22 {strides = array<i32>} : memref<1x1x4x4xf32, #tpu.memory_space<vmem>>, vector<1x1x4x4xf32>,
      %cst_27 = arith.constant 0.000000e+00 : f32
      %24 = vector.broadcast %cst_27 : f32 to vector<1x1x4x1xf32>
      %c0_28 = arith.constant 0 : index
      %c0_29 = arith.constant 0 : index
      %c0_30 = arith.constant 0 : index
      %c0_31 = arith.constant 0 : index
      %25 = vector.load %arg6[%c0_28, %c0_29, %c0_30, %c0_31] : memref<1x1x4x1xf32, #tpu.memory_space<vmem>>, vector<1x1x4x1xf32>
      tpu.vector_store %arg6[%c0_28, %c0_29, %c0_30, %c0_31], %24 {strides = array<i32>} : memref<1x1x4x1xf32, #tpu.memory_space<vmem>>, vector<1x1x4x1xf32>,
    } else {
    }
    %c0 = arith.constant 0 : index
    %c0_2 = arith.constant 0 : index
    %c0_3 = arith.constant 0 : index
    %5 = vector.load %arg4[%c0, %c0_2, %c0_3] : memref<1x4x256xf32, #tpu.memory_space<vmem>>, vector<1x4x256xf32>
    %6 = vector.shape_cast %5 : vector<1x4x256xf32> to vector<4x256xf32>
    %c0_4 = arith.constant 0 : index
    %c0_5 = arith.constant 0 : index
    %c0_6 = arith.constant 0 : index
    %c0_7 = arith.constant 0 : index
    %7 = vector.load %arg5[%c0_4, %c0_5, %c0_6, %c0_7] : memref<1x1x4x4xf32, #tpu.memory_space<vmem>>, vector<1x1x4x4xf32>
    %8 = vector.shape_cast %7 : vector<1x1x4x4xf32> to vector<4x4xf32>
    %cst = arith.constant dense<0.000000e+00> : vector<4x4xf32>
    %9 = tpu.matmul %6, %6, %cst {dimension_numbers = #tpu.dot_dimension_numbers<[1], [1], [0], [0], [0, 0, 1, 0], [], []>} : vector<4x256xf32>, vector<4x256xf32>, vector<4x4xf32> -> vector<4x4xf32>
    %10 = arith.addf %8, %9 : vector<4x4xf32>
    %c0_8 = arith.constant 0 : index
    %c0_9 = arith.constant 0 : index
    %c0_10 = arith.constant 0 : index
    %c0_11 = arith.constant 0 : index
    %11 = vector.load %arg5[%c0_8, %c0_9, %c0_10, %c0_11] : memref<1x1x4x4xf32, #tpu.memory_space<vmem>>, vector<1x1x4x4xf32>
    %12 = vector.shape_cast %11 : vector<1x1x4x4xf32> to vector<4x4xf32>
    %13 = vector.shape_cast %10 : vector<4x4xf32> to vector<1x1x4x4xf32>
    tpu.vector_store %arg5[%c0_8, %c0_9, %c0_10, %c0_11], %13 {strides = array<i32>} : memref<1x1x4x4xf32, #tpu.memory_space<vmem>>, vector<1x1x4x4xf32>,
    %cst_12 = arith.constant 1.000000e+00 : f32
    %14 = vector.broadcast %cst_12 : f32 to vector<1x256xf32>
    %c0_13 = arith.constant 0 : index
    %c0_14 = arith.constant 0 : index
    %c0_15 = arith.constant 0 : index
    %c0_16 = arith.constant 0 : index
    %15 = vector.load %arg6[%c0_13, %c0_14, %c0_15, %c0_16] : memref<1x1x4x1xf32, #tpu.memory_space<vmem>>, vector<1x1x4x1xf32>
    %16 = vector.shape_cast %15 : vector<1x1x4x1xf32> to vector<4x1xf32>
    %cst_17 = arith.constant dense<0.000000e+00> : vector<4x1xf32>
    %17 = tpu.matmul %6, %14, %cst_17 {dimension_numbers = #tpu.dot_dimension_numbers<[1], [1], [0], [0], [0, 0, 1, 0], [], []>} : vector<4x256xf32>, vector<1x256xf32>, vector<4x1xf32> -> vector<4x1xf32>
    %18 = arith.addf %16, %17 : vector<4x1xf32>
    %c0_18 = arith.constant 0 : index
    %c0_19 = arith.constant 0 : index
    %c0_20 = arith.constant 0 : index
    %c0_21 = arith.constant 0 : index
    %19 = vector.load %arg6[%c0_18, %c0_19, %c0_20, %c0_21] : memref<1x1x4x1xf32, #tpu.memory_space<vmem>>, vector<1x1x4x1xf32>
    %20 = vector.shape_cast %19 : vector<1x1x4x1xf32> to vector<4x1xf32>
    %21 = vector.shape_cast %18 : vector<4x1xf32> to vector<1x1x4x1xf32>
    tpu.vector_store %arg6[%c0_18, %c0_19, %c0_20, %c0_21], %21 {strides = array<i32>} : memref<1x1x4x1xf32, #tpu.memory_space<vmem>>, vector<1x1x4x1xf32>,
    return
  }
  func.func @transform_0(%arg0: i32, %arg1: i32, %arg2: i32, %arg3: i32) -> (i32, i32, i32) {
    %c1_i32 = arith.constant 1 : i32
    %0 = arith.muli %arg1, %c1_i32 : i32
    %1 = arith.addi %0, %arg2 : i32
    %c0_i32 = arith.constant 0 : i32
    return %1, %arg0, %arg3 : i32, i32, i32
  }
  func.func @transform_1(%arg0: i32, %arg1: i32, %arg2: i32, %arg3: i32) -> (i32, i32, i32, i32) {
    %c0_i32 = arith.constant 0 : i32
    %c0_i32_0 = arith.constant 0 : i32
    %c0_i32_1 = arith.constant 0 : i32
    return %arg0, %arg1, %c0_i32, %c0_i32_0 : i32, i32, i32, i32
  }
  func.func @transform_2(%arg0: i32, %arg1: i32, %arg2: i32, %arg3: i32) -> (i32, i32, i32, i32) {
    %c0_i32 = arith.constant 0 : i32
    %c0_i32_0 = arith.constant 0 : i32
    %c0_i32_1 = arith.constant 0 : i32
    return %arg0, %arg1, %c0_i32, %c0_i32_0 : i32, i32, i32, i32
  }
}

</mosaic_0001>

<bundles_post_ra>
// kernel: tpu_custom_call.1
= control target key start
LH: loop header
LB: loop body
LE: loop exit
PB: predicated region body
PF: predicated region fallthrough
CT: control target
= control target key end

     0   :  { %8 = vsyncpa [#allocation3], 0  ;;  %s873_s0 = inlined_call_operand.hbm [shape: f32[2,4,256], index: 0, kind: input, shape index: {}]   ;;  %s874_s1 = inlined_call_operand.hbm [shape: f32[1,2,4,4], index: 1, kind: output, shape index: {0}]   ;;  %s875_s2 = inlined_call_operand.vmem [shape: f32[1,2,4,1], index: 2, kind: output, shape index: {1}]  }
   0x1   :  { %10 = vsyncpa [#allocation3 + $0x1], 0 }
   0x2   :  { %11 = vsyncpa [#allocation4], 0 }
   0x3   :  { %13 = vsyncpa [#allocation4 + $0x1], 0  ;;  %s687_s9 = smov 0   ;;  %s689_s10 = smov 0  }
   0x4   :  { %s691_s11 = smov 0   ;;  %s693_s12 = smov 0  }
   0x5   :  { %s695_s13 = smov 0   ;;  %s697_s14 = smov 0  }
   0x6 LB: > { %s475_s15 = sadd.s32 4294967295, %s667_s14   ;;  %s476_s16 = sadd.s32 4294967294, %s667_s14   ;;  %s667_s14 = sphi %s697_s14, %s19_s14   ;;  %s663_s13 = sphi %s695_s13, %s891_s13   ;;  %s659_s12 = sphi %s693_s12, %s890_s12   ;;  %s655_s11 = sphi %s691_s11, %s889_s11   ;;  %s651_s10 = sphi %s689_s10, %s888_s10   ;;  %s647_s9 = sphi %s687_s9, %s887_s9  }
   0x7   : > { %s41_s17 = sadd.s32 1, %s663_s13  ;;  %s58_s18 = sadd.s32 1, %s655_s11 }
   0x8   : > { %p43_p0 = scmp.ge.s32.totalorder %s41_s17, 2  ;;  %p65_p1 = scmp.ne.s32.totalorder %s655_s11, %s651_s10 }
   0x9   : > { %p66_p2 = scmp.eq.s32.totalorder %s667_s14, 0  ;;  %p71_p3 = scmp.ne.s32.totalorder %s651_s10, %s647_s9 }
   0xa   : > { %s893_s17 = smov (%p43_p0, %s41_s17), 0  ;;  %p72_p5 = scmp.eq.s32.totalorder %s475_s15, 0 }
   0xb   : > { %p728_p4 = por %p66_p2, %p65_p1  ;;  %s51_s20 = ssub.s32 %s663_s13, %s893_s17 }
   0xc   : > { %p97_p6 = scmp.eq.s32.totalorder %s475_s15, 1  ;;  %p56_p7 = scmp.eq.s32.totalorder %s51_s20, 0 }
   0xd   : > { %p734_p8 = por %p72_p5, %p71_p3  ;;  %p103_p10 = scmp.eq.s32.totalorder %s476_s16, 1 }
   0xe   : > { %p738_p9 = por %p97_p6, %p65_p1  ;;  %p503_p13 = scmp.lt.s32.totalorder %s667_s14, 2 }
   0xf   : > { %s743_s23 = scalar_select %p56_p7, %s655_s11, %s58_s18  }
  0x10   : > { %s879_s22 = scalar_select %p738_p9, 1, 0 }
  0x11   : > { %p745_p11 = por %p103_p10, %p71_p3  ;;  %s151_s25 = sand.u32 1, %s655_s11  }
  0x12   : > { %s479_s26 = sshll.u32 %s151_s25, 3  ;;  %s490_s27 = sshll.u32 %s663_s13, 7 }
  0x13   : > { %s880_s24 = scalar_select %p745_p11, 1, 0 }
  0x14   : > { %s756_s30 = scalar_lea.hbm %s873_s0, %s490_s27  ;;  %s155_s3 = scalar_lea.vmem [#allocation2], %s479_s26 }
  0x15   : > { %s168_s4 = sshll.u32 %s155_s3, 4  ;;  %p762_p0 = pnand %p503_p13, %p728_p4  ;;  %s758_s4 = int_to_ptr.vmem [resolvable:$true] %s168_s4 }
  0x16   : > { %s152_s6 = scalar_lea.sflag [#allocation3], %s151_s25  ;;  %s555_s7 = scalar_lea.hbm %s756_s30, 128 }
  0x17   : > { %p556_p3 = scmp.ne.s32.totalorder %s756_s30, %s555_s7  ;;  %p557_p5 = pneg %p762_p0 }
  0x18   : > { %s560_s16 = scalar_lea.hbm %s873_s0, 256  ;;  %p561_p4 = scmp.lt.u32.totalorder %s756_s30, %s873_s0 }
  0x19   : > { %p558_p6 = pnand %p557_p5, %p556_p3  ;;  %p562_p10 = scmp.lt.u32.totalorder %s560_s16, %s555_s7 }
  0x1a   : > { %p564_p12 = scmp.lt.u32.totalorder %s555_s7, %s756_s30 }
  0x1b   : > { %p559_p7 = pneg %p558_p6  ;;  %p563_p13 = por %p562_p10, %p561_p4 }
  0x1d   : > { %p565_p1 = por %p564_p12, %p563_p13 }
  0x1f   : > { %p566_p2 = pnand %p565_p1, %p559_p7 }
  0x21   : > { %569 = shalt.err (!%p566_p2)
}
  0x22   : > { %s570_s20 = scalar_lea.vmem %s758_s4, 128  ;;  %s669_s25 = smov [#allocation2]  }
  0x23   : > { %p571_p3 = scmp.ne.s32.totalorder %s758_s4, %s570_s20  ;;  %s575_s26 = sshll.u32 %s669_s25, 4  ;;  %s576_s26 = int_to_ptr.vmem [resolvable:$false] %s575_s26 }
  0x24   : > { %s577_s27 = scalar_lea.vmem %s576_s26, 256  ;;  %p578_p9 = scmp.lt.s32.totalorder %s758_s4, %s576_s26 }
  0x25   : > { %p573_p6 = pnand %p571_p3, %p557_p5  ;;  %p579_p4 = scmp.lt.s32.totalorder %s577_s27, %s570_s20 }
  0x27   : > { %p574_p11 = pneg %p573_p6  ;;  %p580_p10 = por %p579_p4, %p578_p9 }
  0x29   : > { %p581_p12 = pnand %p580_p10, %p574_p11 }
  0x2b   : > { %584 = shalt.err (!%p581_p12)
}
  0x2c   : > { %498 = dma.hbm_to_vmem [thread:$0]  (!%p762_p0), %s756_s30, 128, %s758_s4, %s152_s6  }
  0x2d   : > { %p882_p1 = scmp.lt.s32.totalorder %s667_s14, 3  ;;  %p883_p2 = scmp.ge.s32.totalorder %s667_s14, 1 }
  0x2f   : > { %p174_p5 = pnand %p883_p2, %p882_p1 }
  0x30   : > { %s798_s28 = sand.u32 (!%p174_p5), 1, %s651_s10  }
  0x31   : > { %177 = sbr.rel (%p174_p5) target bundleno = 292 (0x124), region = 24  ;;  %s483_s29 = sshll.u32 (!%p174_p5), %s798_s28, 3 }
  0x32   : > { %s180_s3 = scalar_lea.sflag (!%p174_p5), [#allocation3], %s798_s28  ;;  %s183_s7 = scalar_lea.vmem (!%p174_p5), [#allocation2], %s483_s29 }
  0x38   : > { %638 = dma.done.wait (%p734_p8), %s180_s3, 128  }
  0x39   : > { %640 = vsyncadd (%p734_p8), %s180_s3, 4294967168  ;;  %s484_s30 = sshll.u32 %s798_s28, 2  ;;  %vm228_vm0 = vcmask 27648   ;;  %v670_v0 = vmov 0.0   ;;  %vm311_vm1 = vcmask 1043456   ;;  %v232_v1 = vld [vmem:[%s183_s7] sm:$0xff] }
  0x3a   : > { %s807_s4 = scalar_lea.vmem [#allocation5], %s484_s30  ;;  %v235_v2 = vcombine.high %v232_v1, %v232_v1  ;;  %v312_v3 = vsel %vm311_vm1, %v232_v1, 0.0  ;;  %p216_p8 = scmp.lt.s32.totalorder %s659_s12, 1  ;;  %vm230_vm2 = vcmask 3072  }
  0x3b   : > { %229 = vst.msk [vmem:[%s807_s4] sm:$0xf] %vm228_vm0, %v670_v0  ;;  %s487_s16 = sshll.u32 %s659_s12, 6  ;;  %s344_s18 = sshll.u32 %s807_s4, 4  ;;  %s824_s18 = int_to_ptr.vmem [resolvable:$true] %s344_s18 }
  0x3c   : > { %237 = vmatprep.subr.mxu0 %v235_v2  ;;  %301 = vmatprep.mubr.f32.mxu0 %v235_v2  ;;  %v313_v4 = vsel %vm311_vm1, %v235_v2, 0.0  ;;  %s217_s21 = scalar_select %p216_p8, %s659_s12, 1 }
  0x3d   : > { %238 = vmatpush1.xpose.msra.mxu0 %v232_v1  ;;  %v314_v5 = vadd.f32 %v313_v4, %v312_v3  ;;  %s822_s25 = scalar_lea.hbm %s874_s1, %s487_s16  ;;  %s321_s26 = scalar_lea.sflag [#allocation4], %s798_s28 }
  0x3e   : > { %s485_s5 = sshll.u32 %s217_s21, 2  ;;  %s585_s27 = scalar_lea.vmem %s824_s18, 64 }
  0x3f   : > { %315 = vadd.xlane.f32.xlu0 %v314_v5  ;;  %s221_s15 = scalar_lea.vmem %s875_s2, %s485_s5  ;;  %p586_p9 = scmp.ne.s32.totalorder %s824_s18, %s585_s27 }
  0x40   : > { %302 = vmatmul.mubr.f32.vlgmr.msra.gmra.mrb[0].mxu0 %v232_v1  ;;  %231 = vst.msk [vmem:[%s221_s15] sm:$0xf] %vm230_vm2, %v670_v0  ;;  %p884_p11 = scmp.ne.s32.totalorder %s879_s22, 0  ;;  %s671_s12 = smov [#allocation5]  }
  0x41   : > { %s589_s29 = sshll.u32 %s671_s12, 4  ;;  %s590_s29 = int_to_ptr.vmem [resolvable:$false] %s589_s29 }
  0x42   : > { %v233_v9 = vld [vmem:[%s807_s4] sm:$0xf]  ;;  %p587_p0 = pnand %p586_p9, %p884_p11  ;;  %s591_s3 = scalar_lea.vmem %s590_s29, 128 }
  0x43   : > { %p592_p13 = scmp.lt.s32.totalorder %s824_s18, %s590_s29  ;;  %p593_p3 = scmp.lt.s32.totalorder %s591_s3, %s585_s27 }
  0x44   : > { %p588_p7 = pneg %p587_p0 }
  0x45   : > { %p594_p6 = por %p593_p3, %p592_p13 }
  0x47   : > { %v310_v6 = vld [vmem:[%s221_s15] sm:$0xf]  ;;  %p595_p4 = pnand %p594_p6, %p588_p7 }
  0xcc   : > { %v316_v7 = vpop.xlane.xlu0 %315 }
  0xcd   : > { %v317_v8 = vadd.f32 %v316_v7, %v310_v6 }
  0xcf   : > { %319 = vst.msk [vmem:[%s221_s15] sm:$0xf] %vm230_vm2, %v317_v8 }
 0x113   : > { %v303_v10 = vpop.f32.mrb[0].mxu0 }
 0x114   : > { %v307_v11 = vadd.f32 %v303_v10, %v233_v9  ;;  %v305_v12 = vpop.f32.mrb[1].mxu0 }
 0x116   : > { %309 = vst.msk [vmem:[%s807_s4] sm:$0xf] %vm228_vm0, %v307_v11 }
 0x117   : > { %598 = shalt.err (!%p595_p4)
}
 0x118   : > { %s599_s28 = scalar_lea.hbm %s822_s25, 64  ;;  %s603_s4 = scalar_lea.hbm %s874_s1, 128 }
 0x119   : > { %p600_p10 = scmp.ne.s32.totalorder %s822_s25, %s599_s28  ;;  %p604_p2 = scmp.lt.u32.totalorder %s822_s25, %s874_s1 }
 0x11a   : > { %p605_p5 = scmp.lt.u32.totalorder %s603_s4, %s599_s28  ;;  %p607_p9 = scmp.lt.u32.totalorder %s599_s28, %s822_s25 }
 0x11b   : > { %p601_p12 = pnand %p600_p10, %p884_p11 }
 0x11c   : > { %p606_p8 = por %p605_p5, %p604_p2 }
 0x11d   : > { %p602_p1 = pneg %p601_p12 }
 0x11e   : > { %p608_p0 = por %p607_p9, %p606_p8 }
 0x120   : > { %p609_p7 = pnand %p608_p0, %p602_p1 }
 0x122   : > { %612 = shalt.err (!%p609_p7)
}
 0x123   : > { %493 = dma.vmem_to_hbm [thread:$0]  (%p884_p11), %s824_s18, 64, %s822_s25, %s321_s26  }
 0x124 PF: > { %s359_s6 = sand.u32 1, %s647_s9   ;;  %p885_p13 = scmp.ne.s32.totalorder %s880_s24, 0 }
 0x125   : > { %p886_p3 = scmp.ge.s32.totalorder %s667_s14, 2  ;;  %s360_s8 = scalar_lea.sflag [#allocation4], %s359_s6 }
 0x127   : > { %p500_p6 = pnand %p886_p3, %p885_p13 }
 0x129   : > { %642 = dma.done.wait (!%p500_p6), %s360_s8, 64  }
 0x12a   : > { %644 = vsyncadd (!%p500_p6), %s360_s8, 4294967232  ;;  %s19_s14 = sadd.s32 1, %s667_s14   ;;  %s887_s9 = smov %s651_s10 }
 0x12b   : > { %p16_p4 = scmp.ge.s32.totalorder %s19_s14, 4   ;;  %s888_s10 = smov %s655_s11 }
 0x12c   : > { %s889_s11 = smov %s743_s23  ;;  %s890_s12 = smov %s663_s13 }
 0x12d   : > { %s891_s13 = smov %s893_s17  ;;  %18 = sbr.rel (!%p16_p4) target bundleno = 6 (0x6), region = 85 }
 0x134   :  { %376 = vsyncpa [#allocation3], 1 }
 0x135   :  { %378 = vsyncpa [#allocation3 + $0x1], 1 }
 0x136   :  { %379 = vsyncpa [#allocation4], 1 }
 0x137   :  { %381 = vsyncpa [#allocation4 + $0x1], 1 }

</bundles_post_ra>
